<compile_context>
chip_gen: v6e
topology: v6e:2x2x1
jax: 0.10.0
libtpu: 0.0.40
codegen_flags: <defaults>
</compile_context>

<pallas_src>
import functools

import jax
import jax.numpy as jnp
from jax import lax
from jax.experimental import pallas as pl
from jax.experimental.pallas import tpu as pltpu

EPS = 0.001  # BatchNorm2d eps


# --------------------------------------------------------------------------
# Per-generation VMEM budgets.
# --------------------------------------------------------------------------
def _budgets():
    """Returns (block_budget_bytes, vmem_limit_bytes) for the local TPU gen."""
    try:
        vmem = int(pltpu.get_tpu_info().vmem_capacity_bytes)
    except Exception:
        vmem = 64 * 1024 * 1024  # conservative (v7x-sized) fallback
    if vmem >= 100 * 1024 * 1024:          # v5e / v6e: 128 MiB physical
        return 12 * 1024 * 1024, 64 * 1024 * 1024
    return 8 * 1024 * 1024, 48 * 1024 * 1024   # v7x: 64 MiB physical


# --------------------------------------------------------------------------
# Fused single-read path: one channel-tile slab (N, tc, HW) resident in VMEM.
# --------------------------------------------------------------------------
def _fused_kernel(w_ref, gamma_ref, beta_ref, x_ref, o_ref, *, inv_count):
    # w_ref: SMEM (1, 2) = [w0, w1]; gamma/beta: (TC, 1); x/o: (N, TC, HW).
    x = x_ref[...].astype(jnp.float32)                              # (N, TC, HW)
    s = jnp.sum(jnp.sum(x, axis=2, keepdims=True), axis=0, keepdims=True)
    mean = s * inv_count                                            # (1, TC, 1)
    xc = x - mean
    var = jnp.sum(jnp.sum(xc * xc, axis=2, keepdims=True), axis=0,
                  keepdims=True) * inv_count                        # (1, TC, 1)
    inv_std = lax.rsqrt(var + EPS)
    g_inv = gamma_ref[...][None, :, :] * inv_std                    # (1, TC, 1)
    w0 = w_ref[0, 0]
    w1 = w_ref[0, 1]
    bn = xc * g_inv + beta_ref[...][None, :, :]
    o_ref[...] = (w0 * x + w1 * bn).astype(o_ref.dtype)


def _fused_channel_tile(N, C, HW, budget_bytes):
    """Largest legal channel tile whose f32 slab fits the fused budget."""
    def slab_f32(tc):
        return N * tc * HW * 4
    if C % 8 == 0:
        for t in range(C, 7, -8):                 # multiples of 8 dividing C
            if C % t == 0 and slab_f32(t) <= budget_bytes:
                return t
        return None
    # C not a multiple of 8: a full-C block is exempt from the sublane rule.
    return C if slab_f32(C) <= budget_bytes else None


def _adaptive_norm_fused(x3, w, gamma2d, beta2d, tc, vmem_limit):
    N, C, HW = x3.shape
    n_c = C // tc
    return pl.pallas_call(
        functools.partial(_fused_kernel, inv_count=1.0 / float(N * HW)),
        grid=(n_c,),
        in_specs=[
            pl.BlockSpec(memory_space=pltpu.SMEM),              # [w0, w1]
            pl.BlockSpec((tc, 1), lambda c: (c, 0)),            # gamma
            pl.BlockSpec((tc, 1), lambda c: (c, 0)),            # beta
            pl.BlockSpec((N, tc, HW), lambda c: (0, c, 0)),     # x slab
        ],
        out_specs=pl.BlockSpec((N, tc, HW), lambda c: (0, c, 0)),
        out_shape=jax.ShapeDtypeStruct((N, C, HW), x3.dtype),
        compiler_params=pltpu.CompilerParams(
            dimension_semantics=("parallel",),
            vmem_limit_bytes=vmem_limit),
    )(w, gamma2d, beta2d, x3)


# --------------------------------------------------------------------------
# Two-pass row-view fallback for tensors too large for the fused path.
# --------------------------------------------------------------------------
def _row_stats_kernel(x_ref, sum_ref, sumsq_ref):
    # x_ref: (TR, THW); sum/sumsq: (TR, 1) resident accumulators.
    @pl.when(pl.program_id(1) == 0)
    def _():
        sum_ref[...] = jnp.zeros_like(sum_ref)
        sumsq_ref[...] = jnp.zeros_like(sumsq_ref)

    x = x_ref[...].astype(jnp.float32)
    sum_ref[...] += jnp.sum(x, axis=1, keepdims=True)
    sumsq_ref[...] += jnp.sum(x * x, axis=1, keepdims=True)


def _row_apply_kernel(scale_ref, shift_ref, x_ref, o_ref):
    # Fully folded per-row affine; no per-step rsqrt or extra refs.
    x = x_ref[...].astype(jnp.float32)
    o_ref[...] = (x * scale_ref[...] + shift_ref[...]).astype(o_ref.dtype)


def _row_tiles(R, HW, itemsize, budget):
    """Returns (tr, thw, R_pad, hw_pad) for the (N*C, HW) row view."""
    # Rows: multiples of 8 (f32 sublane). Pad rows only when a full-R row tile
    # could not possibly fit the block budget.
    if R % 8 == 0:
        R_pad = R
    elif R * min(HW, 128) * itemsize <= budget:
        R_pad = R                      # full-R blocks are small enough
    else:
        R_pad = ((R + 7) // 8) * 8
    tr0 = 8 if R_pad % 8 == 0 else R_pad

    # Lanes: full row if it fits, else largest 128-multiple divisor of HW under
    # the budget, else pad HW up to a multiple of a 128-multiple tile.
    if tr0 * HW * itemsize <= budget:
        thw, hw_pad = HW, HW
    else:
        max_thw = max(128, (budget // (tr0 * itemsize)) // 128 * 128)
        thw = None
        if HW % 128 == 0:
            for t in range(min(max_thw, HW), 127, -128):
                if HW % t == 0:
                    thw = t
                    break
        if thw is None:
            thw = min(max_thw, ((HW + 127) // 128) * 128)
            hw_pad = ((HW + thw - 1) // thw) * thw
        else:
            hw_pad = HW

    # Grow the row tile (multiples of 8 dividing R_pad) to fill the budget.
    tr = tr0
    if R_pad % 8 == 0:
        start = min(R_pad, max(8, (budget // (thw * itemsize)) // 8 * 8))
        for t in range(start, 7, -8):
            if R_pad % t == 0:
                tr = t
                break
    return tr, thw, R_pad, hw_pad


def _adaptive_norm_two_pass(x_nchw, w0, w1, gamma, beta, block_budget, vmem_limit):
    N, C, H, W = x_nchw.shape
    HW = H * W
    R = N * C
    dtype = x_nchw.dtype
    itemsize = jnp.dtype(dtype).itemsize

    x2 = x_nchw.reshape(R, HW)                    # free metadata reshape
    tr, thw, R_pad, hw_pad = _row_tiles(R, HW, itemsize, block_budget)
    if (R_pad, hw_pad) != (R, HW):
        # Zero padding is exact for sum / sum-of-squares (inv_count uses the
        # true N*H*W); padded outputs are sliced off below.
        x2 = jnp.pad(x2, ((0, R_pad - R), (0, hw_pad - HW)))
    n_r = R_pad // tr
    n_l = hw_pad // thw

    # ---- Pass 1: per-row sum / sum-of-squares over HW. ----
    rsum, rsumsq = pl.pallas_call(
        _row_stats_kernel,
        grid=(n_r, n_l),
        in_specs=[pl.BlockSpec((tr, thw), lambda r, l: (r, l))],
        out_specs=[pl.BlockSpec((tr, 1), lambda r, l: (r, 0)),
                   pl.BlockSpec((tr, 1), lambda r, l: (r, 0))],
        out_shape=[jax.ShapeDtypeStruct((R_pad, 1), jnp.float32),
                   jax.ShapeDtypeStruct((R_pad, 1), jnp.float32)],
        compiler_params=pltpu.CompilerParams(
            dimension_semantics=("parallel", "arbitrary"),
            vmem_limit_bytes=vmem_limit),
    )(x2)

    # ---- Per-channel scale / shift in tiny plain JAX. ----
    inv_count = 1.0 / float(N * HW)
    sum_c = jnp.sum(rsum[:R, 0].reshape(N, C), axis=0)
    sumsq_c = jnp.sum(rsumsq[:R, 0].reshape(N, C), axis=0)
    mean = sum_c * inv_count
    # One-pass E[x^2]-E[x]^2 (clamped >= 0); the fused path uses exact
    # centered variance for offset-heavy activations.
    var = jnp.maximum(sumsq_c * inv_count - mean * mean, 0.0)
    inv_std = lax.rsqrt(var + EPS)
    g_inv = gamma.astype(jnp.float32) * inv_std
    w0f = jnp.asarray(w0, jnp.float32)
    w1f = jnp.asarray(w1, jnp.float32)
    scale_c = w0f + w1f * g_inv                                   # (C,)
    shift_c = w1f * (beta.astype(jnp.float32) - mean * g_inv)     # (C,)
    scale_r = jnp.broadcast_to(scale_c[None, :], (N, C)).reshape(R, 1)
    shift_r = jnp.broadcast_to(shift_c[None, :], (N, C)).reshape(R, 1)
    if R_pad != R:
        scale_r = jnp.pad(scale_r, ((0, R_pad - R), (0, 0)))
        shift_r = jnp.pad(shift_r, ((0, R_pad - R), (0, 0)))

    # ---- Pass 2: elementwise x * scale + shift (fully parallel). ----
    out2 = pl.pallas_call(
        _row_apply_kernel,
        grid=(n_r, n_l),
        in_specs=[pl.BlockSpec((tr, 1), lambda r, l: (r, 0)),
                  pl.BlockSpec((tr, 1), lambda r, l: (r, 0)),
                  pl.BlockSpec((tr, thw), lambda r, l: (r, l))],
        out_specs=pl.BlockSpec((tr, thw), lambda r, l: (r, l)),
        out_shape=jax.ShapeDtypeStruct((R_pad, hw_pad), dtype),
        compiler_params=pltpu.CompilerParams(
            dimension_semantics=("parallel", "parallel"),
            vmem_limit_bytes=vmem_limit),
    )(scale_r, shift_r, x2)

    return out2[:R, :HW].reshape(N, C, H, W)


# --------------------------------------------------------------------------
# Public wrapper: dispatch fused fast path vs. two-pass fallback.
# --------------------------------------------------------------------------
def adaptive_norm(x_nchw, w0, w1, gamma, beta):
    """x_nchw: (N, C, H, W). Returns (N, C, H, W) = w0*x + w1*BN_train(x)."""
    N, C, H, W = x_nchw.shape
    HW = H * W
    block_budget, vmem_limit = _budgets()

    # Fused path if one channel-tile f32 slab (N, tc, HW) fits comfortably
    # (pipeline buffers + in-kernel f32 working set stay under vmem_limit).
    fused_budget = min(block_budget, vmem_limit // 8)
    tc = _fused_channel_tile(N, C, HW, fused_budget)
    if tc is not None:
        x3 = x_nchw.reshape(N, C, HW)
        w = jnp.stack([jnp.asarray(w0, jnp.float32).reshape(()),
                       jnp.asarray(w1, jnp.float32).reshape(())]).reshape(1, 2)
        gamma2d = gamma.reshape(C, 1).astype(jnp.float32)
        beta2d = beta.reshape(C, 1).astype(jnp.float32)
        out3 = _adaptive_norm_fused(x3, w, gamma2d, beta2d, tc, vmem_limit)
        return out3.reshape(N, C, H, W)

    return _adaptive_norm_two_pass(x_nchw, w0, w1, gamma, beta,
                                   block_budget, vmem_limit)


def adaptive_norm_ref(x, w0, w1, gamma, beta):
    # Pure-JAX reference mirroring PyTorch training-mode BatchNorm2d.
    mean = jnp.mean(x, axis=(0, 2, 3), keepdims=True)
    var = jnp.mean((x - mean) ** 2, axis=(0, 2, 3), keepdims=True)   # biased
    bn = (x - mean) / jnp.sqrt(var + EPS)
    bn = bn * gamma.reshape(1, -1, 1, 1) + beta.reshape(1, -1, 1, 1)
    return w0 * x + w1 * bn


if __name__ == "__main__":
    key = jax.random.PRNGKey(0)

    def _check(out, x, w0, w1, gamma, beta):
        ref = adaptive_norm_ref(x, w0, w1, gamma, beta)
        assert out.shape == x.shape
        err = float(jnp.max(jnp.abs(out - ref)))
        assert jnp.allclose(out, ref, atol=1e-4, rtol=1e-4), err

    # --- Fused single-read path, module-init parameters ---
    for i, shape in enumerate([(2, 4, 16, 16),      # C % 8 != 0 -> full-C tile
                               (2, 16, 16, 16)]):   # 8/16-channel tiles
        n, c, h, w = shape
        x = jax.random.normal(jax.random.fold_in(key, i), shape, jnp.float32)
        w0 = jnp.float32(0.0)                 # self.w_0
        w1 = jnp.float32(1.0)                 # self.w_1
        gamma = jnp.ones((c,), jnp.float32)   # bn.weight
        beta = jnp.zeros((c,), jnp.float32)   # bn.bias
        out = jax.block_until_ready(adaptive_norm(x, w0, w1, gamma, beta))
        _check(out, x, w0, w1, gamma, beta)

    # --- Fused path, non-trivial weights / affine params / offset data ---
    shape = (2, 8, 16, 16)
    n, c, h, w = shape
    x = 3.0 + 2.0 * jax.random.normal(jax.random.fold_in(key, 7), shape, jnp.float32)
    w0 = jnp.float32(0.3)
    w1 = jnp.float32(0.7)
    gamma = jax.random.normal(jax.random.fold_in(key, 8), (c,), jnp.float32)
    beta = jax.random.normal(jax.random.fold_in(key, 9), (c,), jnp.float32)
    out = jax.block_until_ready(adaptive_norm(x, w0, w1, gamma, beta))
    _check(out, x, w0, w1, gamma, beta)

    # --- Two-pass fallback (tiny budget forces HW tiling / zero-padding) ---
    for shape, budget in [((2, 4, 16, 16), 4096),   # HW % 128 == 0 tiling
                          ((2, 4, 10, 20), 4096)]:  # HW padded to 128-multiple
        n, c, h, w = shape
        x = jax.random.normal(jax.random.fold_in(key, 100 + h), shape, jnp.float32)
        w0 = jnp.float32(0.25)
        w1 = jnp.float32(0.75)
        gamma = jnp.ones((c,), jnp.float32)
        beta = jnp.zeros((c,), jnp.float32)
        out = jax.block_until_ready(
            _adaptive_norm_two_pass(x, w0, w1, gamma, beta,
                                    block_budget=budget,
                                    vmem_limit=32 * 1024 * 1024))
        _check(out, x, w0, w1, gamma, beta)

    print("KERNEL_OK")
</pallas_src>

<mosaic_0001>
module attributes {stable_mosaic.version = 11 : i64} {
  func.func @_fused_kernel(%arg0: i32, %arg1: memref<1x2xf32, #tpu.memory_space<smem>>, %arg2: memref<4x1xf32, #tpu.memory_space<vmem>>, %arg3: memref<4x1xf32, #tpu.memory_space<vmem>>, %arg4: memref<2x4x256xf32, #tpu.memory_space<vmem>>, %arg5: memref<2x4x256xf32, #tpu.memory_space<vmem>>) attributes {dimension_semantics = [#tpu.dimension_semantics<parallel>], iteration_bounds = array<i64: 1>, scalar_prefetch = 0 : i64, scratch_operands = 0 : i64, tpu.core_type = #tpu.core_type<tc>, window_params = [{transform_indices = @transform_0, window_bounds = array<i64: 1, 2>}, {transform_indices = @transform_1, window_bounds = array<i64: 4, 1>}, {transform_indices = @transform_2, window_bounds = array<i64: 4, 1>}, {transform_indices = @transform_3, window_bounds = array<i64: 2, 4, 256>}, {transform_indices = @transform_4, window_bounds = array<i64: 2, 4, 256>}]} {
    %c0 = arith.constant 0 : index
    %c0_0 = arith.constant 0 : index
    %c0_1 = arith.constant 0 : index
    %0 = vector.load %arg4[%c0, %c0_0, %c0_1] : memref<2x4x256xf32, #tpu.memory_space<vmem>>, vector<2x4x256xf32>
    %cst = arith.constant dense<0.000000e+00> : vector<2x4xf32>
    %1 = vector.multi_reduction <add>, %0, %cst [2] : vector<2x4x256xf32> to vector<2x4xf32>
    %2 = vector.shape_cast %1 : vector<2x4xf32> to vector<2x4x1xf32>
    %cst_2 = arith.constant dense<0.000000e+00> : vector<4x1xf32>
    %3 = vector.multi_reduction <add>, %2, %cst_2 [0] : vector<2x4x1xf32> to vector<4x1xf32>
    %4 = vector.shape_cast %3 : vector<4x1xf32> to vector<1x4x1xf32>
    %cst_3 = arith.constant 0.001953125 : f32
    %5 = vector.broadcast %cst_3 : f32 to vector<1x4x1xf32>
    %6 = arith.mulf %4, %5 : vector<1x4x1xf32>
    %7 = vector.broadcast %6 : vector<1x4x1xf32> to vector<2x4x256xf32>
    %8 = arith.subf %0, %7 : vector<2x4x256xf32>
    %9 = arith.mulf %8, %8 : vector<2x4x256xf32>
    %cst_4 = arith.constant dense<0.000000e+00> : vector<2x4xf32>
    %10 = vector.multi_reduction <add>, %9, %cst_4 [2] : vector<2x4x256xf32> to vector<2x4xf32>
    %11 = vector.shape_cast %10 : vector<2x4xf32> to vector<2x4x1xf32>
    %cst_5 = arith.constant dense<0.000000e+00> : vector<4x1xf32>
    %12 = vector.multi_reduction <add>, %11, %cst_5 [0] : vector<2x4x1xf32> to vector<4x1xf32>
    %13 = vector.shape_cast %12 : vector<4x1xf32> to vector<1x4x1xf32>
    %cst_6 = arith.constant 0.001953125 : f32
    %14 = vector.broadcast %cst_6 : f32 to vector<1x4x1xf32>
    %15 = arith.mulf %13, %14 : vector<1x4x1xf32>
    %cst_7 = arith.constant 1.000000e-03 : f32
    %16 = vector.broadcast %cst_7 : f32 to vector<1x4x1xf32>
    %17 = arith.addf %15, %16 : vector<1x4x1xf32>
    %18 = math.rsqrt %17 : vector<1x4x1xf32>
    %c0_8 = arith.constant 0 : index
    %c0_9 = arith.constant 0 : index
    %19 = vector.load %arg2[%c0_8, %c0_9] : memref<4x1xf32, #tpu.memory_space<vmem>>, vector<4x1xf32>
    %20 = vector.shape_cast %19 : vector<4x1xf32> to vector<1x4x1xf32>
    %21 = arith.mulf %20, %18 : vector<1x4x1xf32>
    %c0_10 = arith.constant 0 : index
    %c0_11 = arith.constant 0 : index
    %22 = memref.load %arg1[%c0_10, %c0_11] : memref<1x2xf32, #tpu.memory_space<smem>>
    %c0_12 = arith.constant 0 : index
    %c1 = arith.constant 1 : index
    %23 = memref.load %arg1[%c0_12, %c1] : memref<1x2xf32, #tpu.memory_space<smem>>
    %24 = vector.broadcast %21 : vector<1x4x1xf32> to vector<2x4x256xf32>
    %25 = arith.mulf %8, %24 : vector<2x4x256xf32>
    %c0_13 = arith.constant 0 : index
    %c0_14 = arith.constant 0 : index
    %26 = vector.load %arg3[%c0_13, %c0_14] : memref<4x1xf32, #tpu.memory_space<vmem>>, vector<4x1xf32>
    %27 = vector.shape_cast %26 : vector<4x1xf32> to vector<1x4x1xf32>
    %28 = vector.broadcast %27 : vector<1x4x1xf32> to vector<2x4x256xf32>
    %29 = arith.addf %25, %28 : vector<2x4x256xf32>
    %30 = vector.broadcast %22 : f32 to vector<2x4x256xf32>
    %31 = arith.mulf %30, %0 : vector<2x4x256xf32>
    %32 = vector.broadcast %23 : f32 to vector<2x4x256xf32>
    %33 = arith.mulf %32, %29 : vector<2x4x256xf32>
    %34 = arith.addf %31, %33 : vector<2x4x256xf32>
    %c0_15 = arith.constant 0 : index
    %c0_16 = arith.constant 0 : index
    %c0_17 = arith.constant 0 : index
    %35 = vector.load %arg5[%c0_15, %c0_16, %c0_17] : memref<2x4x256xf32, #tpu.memory_space<vmem>>, vector<2x4x256xf32>
    tpu.vector_store %arg5[%c0_15, %c0_16, %c0_17], %34 {strides = array<i32>} : memref<2x4x256xf32, #tpu.memory_space<vmem>>, vector<2x4x256xf32>,
    return
  }
  func.func @transform_0(%arg0: i32) -> (i32, i32) {
    %c0_i32 = arith.constant 0 : i32
    %c0_i32_0 = arith.constant 0 : i32
    %c0_i32_1 = arith.constant 0 : i32
    return %c0_i32, %c0_i32_0 : i32, i32
  }
  func.func @transform_1(%arg0: i32) -> (i32, i32) {
    %c0_i32 = arith.constant 0 : i32
    %c0_i32_0 = arith.constant 0 : i32
    return %arg0, %c0_i32 : i32, i32
  }
  func.func @transform_2(%arg0: i32) -> (i32, i32) {
    %c0_i32 = arith.constant 0 : i32
    %c0_i32_0 = arith.constant 0 : i32
    return %arg0, %c0_i32 : i32, i32
  }
  func.func @transform_3(%arg0: i32) -> (i32, i32, i32) {
    %c0_i32 = arith.constant 0 : i32
    %c0_i32_0 = arith.constant 0 : i32
    %c0_i32_1 = arith.constant 0 : i32
    return %c0_i32, %arg0, %c0_i32_0 : i32, i32, i32
  }
  func.func @transform_4(%arg0: i32) -> (i32, i32, i32) {
    %c0_i32 = arith.constant 0 : i32
    %c0_i32_0 = arith.constant 0 : i32
    %c0_i32_1 = arith.constant 0 : i32
    return %c0_i32, %arg0, %c0_i32_0 : i32, i32, i32
  }
}

</mosaic_0001>

<bundles_post_ra>
// kernel: tpu_custom_call.1
= control target key start
LH: loop header
LB: loop body
LE: loop exit
PB: predicated region body
PF: predicated region fallthrough
CT: control target
= control target key end

     0   :  { %9 = vsyncpa [#allocation5], 0  ;;  %s315_s0 = inlined_call_operand.vmem [shape: f32[1,2], index: 0, kind: input, shape index: {}]   ;;  %s316_s1 = inlined_call_operand.vmem [shape: f32[4,1], index: 1, kind: input, shape index: {}]   ;;  %s317_s2 = inlined_call_operand.vmem [shape: f32[4,1], index: 2, kind: input, shape index: {}]   ;;  %s318_s3 = inlined_call_operand.hbm [shape: f32[2,4,256], index: 3, kind: input, shape index: {}]   ;;  %s319_s4 = inlined_call_operand.hbm [shape: f32[2,4,256], index: 4, kind: output, shape index: {}]  }
   0x1   :  { %10 = vsyncpa [#allocation3], 0 }
   0x2   :  { %11 = vsyncpa [#allocation4], 0  ;;  %s18_s17 = sshll.u32 %s315_s0, 4  ;;  %s19_s17 = int_to_ptr.vmem [resolvable:$true] %s18_s17 }
   0x3   :  { %s178_s18 = scalar_lea.vmem %s19_s17, 16  ;;  %p183_p1 = scmp.lt.s32.totalorder %s19_s17, %s19_s17 }
   0x4   :  { %p179_p0 = scmp.ne.s32.totalorder %s19_s17, %s178_s18  ;;  %p184_p2 = scmp.lt.s32.totalorder %s178_s18, %s178_s18 }
   0x6   :  { %p185_p3 = por %p184_p2, %p183_p1 }
   0x8   :  { %p186_p4 = pnand %p185_p3, %p179_p0 }
   0xa   :  { %189 = shalt.err (!%p186_p4)
}
   0xb   :  { %s236_s19 = smov [#allocation2]   ;;  %s237_s20 = smov [#allocation6]  }
   0xc   :  { %21 = dma.vmem_to_smem %s19_s17, 16, %s236_s19, [#allocation5]  }
   0xd   :  { %s31_s21 = sshll.u32 %s237_s20, 4  ;;  %s32_s21 = int_to_ptr.vmem [resolvable:$true] %s31_s21 }
   0xe   :  { %s198_s22 = scalar_lea.vmem %s32_s21, 256  ;;  %p203_p6 = scmp.lt.s32.totalorder %s32_s21, %s32_s21 }
   0xf   :  { %p199_p5 = scmp.ne.s32.totalorder %s32_s21, %s198_s22  ;;  %p204_p7 = scmp.lt.s32.totalorder %s198_s22, %s198_s22 }
  0x11   :  { %p205_p8 = por %p204_p7, %p203_p6 }
  0x13   :  { %p206_p9 = pnand %p205_p8, %p199_p5 }
  0x15   :  { %209 = shalt.err (!%p206_p9)
}
  0x16   :  { %s238_s0 = smov 128   ;;  %s239_s23 = smov 8  }
  0x17   :  { %37 = dma.hbm_to_vmem [thread:$0]  %s318_s3, 256, %s32_s21, [#allocation3], %s238_s0, %s238_s0, %s239_s23  }
  0x18   :  { %230 = dma.done.wait [#allocation5], 16  }
  0x19   :  { %231 = vsyncadd [#allocation5], 4294967280 }
  0x1a   :  { %232 = dma.done.wait [#allocation3], 256  }
  0x1b   :  { %233 = vsyncadd [#allocation3], 4294967040 }
  0x1c   :  { %44 = sfence }
  0x1d   :  { %v277_v0 = vld [vmem:[#allocation6] sm:$0xff]  ;;  %vm53_vm0 = vcmask 1043456   ;;  %v279_v1 = vld [vmem:[#allocation6 + $0x8] sm:$0xff]  ;;  %v240_v10 = vmov 839922192   ;;  %v72_v12 = vlaneseq  ;;  %v241_v35 = vmov 0  }
  0x1e   :  { %v49_v2 = vcombine.high %v277_v0, %v277_v0  ;;  %v54_v3 = vsel %vm53_vm0, %v277_v0, 0.0  ;;  %v50_v4 = vcombine.high %v279_v1, %v279_v1  ;;  %v59_v6 = vsel %vm53_vm0, %v279_v1, 0.0  ;;  %172 = vset.pattern.permute.xlu0 %v241_v35  ;;  %173 = vset.pattern.permute.xlu1 %v241_v35  ;;  %v121_v36 = vld [vmem:[%s317_s2] sm:$0xf]  ;;  %s105_s29 = sld [smem:[#allocation2]] }
  0x1f   :  { %v70_v11 = vunpack.c.l.s4 %v240_v10  ;;  %v73_v15 = vshrl.u32 %v72_v12, 7  ;;  %v103_v44 = vld [vmem:[%s316_s1] sm:$0xf]  ;;  %s164_s2 = sld [smem:[#allocation2 + $0x1]]  ;;  %s242_s1 = smov [#allocation7]  }
  0x20   :  { %v55_v5 = vsel %vm53_vm0, %v49_v2, 0.0  ;;  %v60_v7 = vsel %vm53_vm0, %v50_v4, 0.0  ;;  %s151_s30 = sshll.u32 %s242_s1, 4  ;;  %s152_s30 = int_to_ptr.vmem [resolvable:$true] %s151_s30 }
  0x21   :  { %v56_v8 = vadd.f32 %v55_v5, %v54_v3  ;;  %v61_v9 = vadd.f32 %v60_v7, %v59_v6  ;;  %v71_v14 = vunpack.c.0.s8 %v70_v11  ;;  %s210_s5 = scalar_lea.vmem %s152_s30, 256  ;;  %p215_p11 = scmp.lt.s32.totalorder %s152_s30, %s152_s30 }
  0x22   :  { %p211_p10 = scmp.ne.s32.totalorder %s152_s30, %s210_s5  ;;  %p216_p12 = scmp.lt.s32.totalorder %s210_s5, %s210_s5 }
  0x23   :  { %57 = vadd.xlane.f32.xlu0 %v56_v8  ;;  %v74_v19 = vsub.s32 %v71_v14, %v73_v15 }
  0x24   :  { %v136_v51 = vstv %s105_s29  ;;  %p217_p13 = por %p216_p12, %p215_p11 }
  0x25   :  { %v139_v54 = vstv %s164_s2  ;;  %v137_v57 = vmul.f32 %v136_v51, %v277_v0  ;;  %v138_v58 = vmul.f32 %v136_v51, %v279_v1 }
  0x26   :  { %p218_p0 = pnand %p217_p13, %p211_p10 }
  0x27   :  { %62 = vadd.xlane.f32.xlu0 %v61_v9 }
  0xac   :  { %v58_v13 = vpop.xlane.xlu0 %57 }
  0xad   :  { %v64_v17 = vsel %vm53_vm0, %v58_v13, 0.0 }
  0xb0   :  { %v63_v16 = vpop.xlane.xlu0 %62 }
  0xb1   :  { %v65_v18 = vsel %vm53_vm0, %v63_v16, 0.0 }
  0xb2   :  { %v66_v20 = vadd.f32 %v65_v18, %v64_v17 }
  0xb4   :  { %v67_v21 = vmul.f32 0.001953125, %v66_v20 }
  0xb6   :  { %v75_v22 = vrot.slane %v67_v21, %v74_v19 }
  0xb8   :  { %v78_v23 = vsub.f32 %v279_v1, %v75_v22  ;;  %v77_v24 = vsub.f32 %v277_v0, %v75_v22 }
  0xba   :  { %v79_v25 = vmul.f32 %v77_v24, %v77_v24  ;;  %v80_v26 = vmul.f32 %v78_v23, %v78_v23 }
  0xbc   :  { %v83_v27 = vcombine.high %v79_v25, %v79_v25  ;;  %v84_v28 = vcombine.high %v80_v26, %v80_v26  ;;  %v87_v29 = vsel %vm53_vm0, %v79_v25, 0.0  ;;  %v92_v33 = vsel %vm53_vm0, %v80_v26, 0.0 }
  0xbe   :  { %v88_v30 = vsel %vm53_vm0, %v83_v27, 0.0  ;;  %v93_v32 = vsel %vm53_vm0, %v84_v28, 0.0 }
  0xbf   :  { %v89_v31 = vadd.f32 %v88_v30, %v87_v29  ;;  %v94_v34 = vadd.f32 %v93_v32, %v92_v33 }
  0xc1   :  { %90 = vadd.xlane.f32.xlu1 %v89_v31 }
  0xc5   :  { %95 = vadd.xlane.f32.xlu1 %v94_v34 }
  0xd6   :  { %124 = vperm.xlu1 %173, %v121_v36  }
 0x14a   :  { %v91_v37 = vpop.xlane.xlu1 %90 }
 0x14b   :  { %v97_v39 = vsel %vm53_vm0, %v91_v37, 0.0 }
 0x14e   :  { %v96_v38 = vpop.xlane.xlu1 %95 }
 0x14f   :  { %v98_v40 = vsel %vm53_vm0, %v96_v38, 0.0 }
 0x150   :  { %v99_v41 = vadd.f32 %v98_v40, %v97_v39 }
 0x152   :  { %v100_v42 = vmul.f32 0.001953125, %v99_v41  ;;  %v125_v47 = vpop.permute.xlu1 %124 }
 0x153   :  { %v132_v50 = vrot.slane %v125_v47, %v74_v19 }
 0x154   :  { %v101_v43 = vadd.f32 0.001, %v100_v42 }
 0x156   :  { %176 = vrsqrt.f32 %v101_v43 }
 0x163   :  { %v177_v45 = vpop.eup %176 }
 0x164   :  { %v104_v46 = vmul.f32 %v177_v45, %v103_v44 }
 0x166   :  { %109 = vperm.xlu0 %172, %v104_v46  }
 0x1e1   :  { %v110_v48 = vpop.permute.xlu0 %109 }
 0x1e2   :  { %v117_v49 = vrot.slane %v110_v48, %v74_v19 }
 0x1e4   :  { %v119_v52 = vmul.f32 %v117_v49, %v77_v24  ;;  %v120_v53 = vmul.f32 %v117_v49, %v78_v23 }
 0x1e6   :  { %v134_v55 = vadd.f32 %v132_v50, %v119_v52  ;;  %v135_v56 = vadd.f32 %v132_v50, %v120_v53 }
 0x1e8   :  { %v140_v59 = vmul.f32 %v139_v54, %v134_v55  ;;  %v141_v60 = vmul.f32 %v139_v54, %v135_v56 }
 0x1ea   :  { %v142_v61 = vadd.f32 %v140_v59, %v137_v57  ;;  %v143_v62 = vadd.f32 %v141_v60, %v138_v58 }
 0x1ec   :  { %144 = vst [vmem:[#allocation7] sm:$0xff] %v142_v61  ;;  %145 = vst [vmem:[#allocation7 + $0x8] sm:$0xff] %v143_v62 }
 0x1ed   :  { %221 = shalt.err (!%p218_p0)
}
 0x1ee   :  { %157 = dma.vmem_to_hbm [thread:$0]  %s152_s30, 256, %s319_s4, [#allocation4], %s238_s0, %s238_s0, %s239_s23  }
 0x1ef   :  { %234 = dma.done.wait [#allocation4], 256  }
 0x1f0   :  { %235 = vsyncadd [#allocation4], 4294967040 }
 0x1f1   :  { %161 = vsyncpa [#allocation3], 1 }
 0x1f2   :  { %162 = vsyncpa [#allocation4], 1 }
 0x1f3   :  { %163 = vsyncpa [#allocation5], 1 }

</bundles_post_ra>
